<compile_context>
chip_gen: v5e
topology: v5e:2x2
jax: 0.10.0
libtpu: 0.0.40
codegen_flags: <defaults>
</compile_context>

<pallas_src>
import functools

import jax
import jax.numpy as jnp
import numpy as np
from jax import lax
from jax.experimental import pallas as pl
from jax.experimental.pallas import tpu as pltpu


def _round_up(x, m):
    return ((x + m - 1) // m) * m


def _dequant_kernel(x_ref, w_ref, o_ref, *, bias, total_bits, block_bits, ragged_g):
    # x_ref: (tn, tg*B) raw float bits; w_ref: (tg*B, tg) bf16 block-diagonal
    # weights with the 1/2**B scale folded in; o_ref: (tn, tg).
    x = x_ref[...]
    if ragged_g:
        # Tail tile along the group axis: out-of-bounds bit columns hold
        # unspecified data; zero-select them so garbage (NaN/Inf) cannot leak
        # into valid output columns through the matmul accumulation.  A VPU
        # select is free filler on a DMA-bound kernel (for non-tail tiles
        # valid >= block_bits, so the select is a no-op).
        j = pl.program_id(1)
        valid = total_bits - j * block_bits
        col = lax.broadcasted_iota(jnp.int32, x.shape, 1)
        x = jnp.where(col < valid, x, 0)
    num = jnp.dot(x.astype(jnp.bfloat16), w_ref[...],
                  preferred_element_type=jnp.float32)
    o_ref[...] = (num + bias).astype(o_ref.dtype)


def _make_block_weights(tg, B):
    # w[j*B + i, j] = 2**(B-1-i) / 2**B = 2**(-1-i)   (1/step folded in).
    # Powers of two are exact in bf16; bits are 0/1 -> f32 MXU accumulation exact.
    w = np.zeros((tg * B, tg), dtype=np.float32)
    col = 2.0 ** (-1.0 - np.arange(B, dtype=np.float64))
    for j in range(tg):
        w[j * B:(j + 1) * B, j] = col
    return jnp.asarray(w, dtype=jnp.bfloat16)


def dequantization_layer(x, B, *, tile_n=512, tile_g=128, out_dtype=jnp.float32):
    """Pallas equivalent of DequantizationLayer(B).forward(x).

    x: (N, L) float bits (0/1), L divisible by B.
    returns: (N, L // B) in `out_dtype` (default float32, matching the module).
    """
    x = jnp.asarray(x)
    if not jnp.issubdtype(x.dtype, jnp.floating):
        x = x.astype(jnp.float32)  # mirrors torch's .type(torch.float32)
    N, L = x.shape
    assert L % B == 0, "bit-stream length must be divisible by B"
    G = L // B
    bias = float(0.5 / (2 ** B))

    # Group (output-column) tile: if G fits in one tile, use full-dim blocks
    # (no partial blocks, no mask); otherwise tile_g (multiple of 128 ->
    # lane-dense stores) with an in-kernel tail mask for the ragged remainder.
    tg = G if G <= tile_g else tile_g
    ragged_g = (G % tg) != 0
    g_tiles = pl.cdiv(G, tg)
    block_bits = tg * B

    # Batch tile: multiple of 8 sublanes, never larger than the batch itself
    # (avoids over-sized blocks); tiny batches use a full-dim block.
    if N < 8:
        tn = N
    else:
        tn = min(_round_up(max(tile_n, 8), 8), (N // 8) * 8)
    # Megacore guard (v7x has 2 TensorCores): keep >= 2 grid blocks when possible.
    if g_tiles * pl.cdiv(N, tn) < 2 and N >= 16:
        tn = max(8, _round_up(-(-N // 2), 8))
    n_tiles = pl.cdiv(N, tn)

    w = _make_block_weights(tg, B)

    kernel = functools.partial(_dequant_kernel, bias=bias, total_bits=L,
                               block_bits=block_bits, ragged_g=ragged_g)
    out = pl.pallas_call(
        kernel,
        out_shape=jax.ShapeDtypeStruct((N, G), out_dtype),
        grid_spec=pltpu.PrefetchScalarGridSpec(
            num_scalar_prefetch=0,
            grid=(n_tiles, g_tiles),
            in_specs=[
                pl.BlockSpec((tn, block_bits), lambda i, j: (i, j)),
                pl.BlockSpec((block_bits, tg), lambda i, j: (0, 0)),
            ],
            out_specs=pl.BlockSpec((tn, tg), lambda i, j: (i, j)),
        ),
        compiler_params=pltpu.CompilerParams(
            dimension_semantics=("parallel", "parallel"),
            vmem_limit_bytes=32 * 1024 * 1024,
        ),
    )(x, w)
    return out


def _reference(x, B):
    # Pure-JAX reference mirroring Bit2Num + Dequantization.forward.
    N, L = x.shape
    step = 2 ** B
    bits = jnp.asarray(x, jnp.float32).reshape(N, L // B, B)
    weights = 2.0 ** (B - 1 - jnp.arange(B, dtype=jnp.float32))
    num = jnp.sum(bits * weights, axis=-1)
    return (num + 0.5) / step


if __name__ == "__main__":
    key = jax.random.PRNGKey(0)
    k1, k2, k3 = jax.random.split(key, 3)

    # Case 1: aligned group axis (B=4, 128 groups -> 512-bit stream), small batch.
    B1, N1, G1 = 4, 8, 128
    bits1 = jax.random.bernoulli(k1, 0.5, (N1, G1 * B1)).astype(jnp.float32)
    out1 = jax.block_until_ready(dequantization_layer(bits1, B1))
    np.testing.assert_allclose(np.asarray(out1), np.asarray(_reference(bits1, B1)),
                               rtol=1e-6, atol=1e-6)
    assert out1.shape == (N1, G1) and out1.dtype == jnp.float32

    # Case 2: small group count handled as a single full-dim tile (G=96 < 128),
    # ragged batch exercising partial batch blocks.
    B2, N2, G2 = 3, 10, 96
    bits2 = jax.random.bernoulli(k2, 0.5, (N2, G2 * B2)).astype(jnp.float32)
    out2 = jax.block_until_ready(dequantization_layer(bits2, B2))
    np.testing.assert_allclose(np.asarray(out2), np.asarray(_reference(bits2, B2)),
                               rtol=1e-6, atol=1e-6)
    assert out2.shape == (N2, G2) and out2.dtype == jnp.float32

    # Case 3: ragged group axis (G=200 -> tiles of 128 + 72) exercising the
    # in-kernel tail mask and a multi-block grid on both axes.
    B3, N3, G3 = 2, 20, 200
    bits3 = jax.random.bernoulli(k3, 0.5, (N3, G3 * B3)).astype(jnp.float32)
    out3 = jax.block_until_ready(dequantization_layer(bits3, B3))
    np.testing.assert_allclose(np.asarray(out3), np.asarray(_reference(bits3, B3)),
                               rtol=1e-6, atol=1e-6)
    assert out3.shape == (N3, G3) and out3.dtype == jnp.float32

    print("KERNEL_OK")
</pallas_src>

<mosaic_0001>
module attributes {stable_mosaic.version = 11 : i64} {
  func.func @_dequant_kernel(%arg0: i32, %arg1: i32, %arg2: memref<8x512xf32, #tpu.memory_space<vmem>>, %arg3: memref<512x128xbf16, #tpu.memory_space<vmem>>, %arg4: memref<8x128xf32, #tpu.memory_space<vmem>>) attributes {dimension_semantics = [#tpu.dimension_semantics<parallel>, #tpu.dimension_semantics<parallel>], iteration_bounds = array<i64: 1, 1>, scalar_prefetch = 0 : i64, scratch_operands = 0 : i64, tpu.core_type = #tpu.core_type<tc>, window_params = [{transform_indices = @transform_0, window_bounds = array<i64: 8, 512>}, {pipeline_mode = #tpu.pipeline_mode<synchronous>, transform_indices = @transform_1, window_bounds = array<i64: 512, 128>}, {transform_indices = @transform_2, window_bounds = array<i64: 8, 128>}]} {
    %c0 = arith.constant 0 : index
    %c0_0 = arith.constant 0 : index
    %0 = vector.load %arg2[%c0, %c0_0] : memref<8x512xf32, #tpu.memory_space<vmem>>, vector<8x512xf32>
    %1 = arith.truncf %0 : vector<8x512xf32> to vector<8x512xbf16>
    %c0_1 = arith.constant 0 : index
    %c0_2 = arith.constant 0 : index
    %2 = vector.load %arg3[%c0_1, %c0_2] : memref<512x128xbf16, #tpu.memory_space<vmem>>, vector<512x128xbf16>
    %cst = arith.constant dense<0.000000e+00> : vector<8x128xf32>
    %3 = tpu.matmul %1, %2, %cst {dimension_numbers = #tpu.dot_dimension_numbers<[1], [0], [0], [1], [0, 0, 1, 1], [], []>} : vector<8x512xbf16>, vector<512x128xbf16>, vector<8x128xf32> -> vector<8x128xf32>
    %cst_3 = arith.constant 3.125000e-02 : f32
    %4 = vector.broadcast %cst_3 : f32 to vector<8x128xf32>
    %5 = arith.addf %3, %4 : vector<8x128xf32>
    %c0_4 = arith.constant 0 : index
    %c0_5 = arith.constant 0 : index
    %6 = vector.load %arg4[%c0_4, %c0_5] : memref<8x128xf32, #tpu.memory_space<vmem>>, vector<8x128xf32>
    tpu.vector_store %arg4[%c0_4, %c0_5], %5 {strides = array<i32>} : memref<8x128xf32, #tpu.memory_space<vmem>>, vector<8x128xf32>,
    return
  }
  func.func @transform_0(%arg0: i32, %arg1: i32) -> (i32, i32) {
    %c0_i32 = arith.constant 0 : i32
    return %arg0, %arg1 : i32, i32
  }
  func.func @transform_1(%arg0: i32, %arg1: i32) -> (i32, i32) {
    %c0_i32 = arith.constant 0 : i32
    %c0_i32_0 = arith.constant 0 : i32
    %c0_i32_1 = arith.constant 0 : i32
    return %c0_i32, %c0_i32_0 : i32, i32
  }
  func.func @transform_2(%arg0: i32, %arg1: i32) -> (i32, i32) {
    %c0_i32 = arith.constant 0 : i32
    return %arg0, %arg1 : i32, i32
  }
}

</mosaic_0001>

<bundles_post_ra>
// kernel: tpu_custom_call.1
= control target key start
LH: loop header
LB: loop body
LE: loop exit
PB: predicated region body
PF: predicated region fallthrough
CT: control target
= control target key end

     0   :  { %7 = vsyncpa [#allocation3], 0  ;;  %s649_s0 = inlined_call_operand.hbm [shape: f32[8,512], index: 0, kind: input, shape index: {}]   ;;  %s650_s1 = inlined_call_operand.hbm [shape: bf16[512,128], index: 1, kind: input, shape index: {}]   ;;  %s651_s2 = inlined_call_operand.hbm [shape: f32[8,128], index: 2, kind: output, shape index: {}]  }
   0x1   :  { %8 = vsyncpa [#allocation6], 0 }
   0x2   :  { %9 = vsyncpa [#allocation4], 0  ;;  %s15_s11 = sshll.u32 %s649_s0, 4  ;;  %s620_s12 = smov [#allocation2]   ;;  %s16_s11 = int_to_ptr.hbm [resolvable:$true] %s15_s11 }
   0x3   :  { %s17_s13 = sshll.u32 %s620_s12, 4  ;;  %s25_s16 = sshll.u32 %s650_s1, 4  ;;  %s18_s13 = int_to_ptr.vmem [resolvable:$true] %s17_s13  ;;  %s26_s16 = int_to_ptr.hbm [resolvable:$true] %s25_s16 }
   0x4   :  { %20 = dma.hbm_to_vmem [thread:$0]  %s16_s11, 512, %s18_s13, [#allocation3]  }
   0x5   :  { %s621_s17 = smov [#allocation5]   ;;  %s622_s19 = smov 64  }
   0x6   :  { %s27_s18 = sshll.u32 %s621_s17, 4  ;;  %s623_s20 = smov 4   ;;  %s28_s18 = int_to_ptr.vmem [resolvable:$true] %s27_s18 }
   0x7   :  { %33 = dma.hbm_to_vmem [thread:$0]  %s26_s16, 4096, %s28_s18, [#allocation6], %s622_s19, %s622_s19, %s623_s20  }
   0x8   :  { %614 = dma.done.wait [#allocation3], 512  }
   0x9   :  { %615 = vsyncadd [#allocation3], 4294966784 }
   0xa   :  { %616 = dma.done.wait [#allocation6], 4096  }
   0xb   :  { %617 = vsyncadd [#allocation6], 4294963200  ;;  %v512_v0 = vld [vmem:[#allocation5 + $0x38] sm:$0xff]  ;;  %v511_v4 = vld [vmem:[#allocation5 + $0x30] sm:$0xff]  ;;  %s624_s0 = smov [#allocation7]   ;;  %s366_s23 = sshll.u32 %s651_s2, 4  ;;  %s367_s23 = int_to_ptr.hbm [resolvable:$true] %s366_s23 }
   0xc   :  { %v520_v1 = vld [vmem:[#allocation5 + $0x78] sm:$0xff]  ;;  %306 = vmatpush.bf16.msra.mxu0 %v512_v0  ;;  %v519_v5 = vld [vmem:[#allocation5 + $0x70] sm:$0xff]  ;;  %v510_v8 = vld [vmem:[#allocation5 + $0x28] sm:$0xff]  ;;  %s364_s1 = sshll.u32 %s624_s0, 4  ;;  %s365_s1 = int_to_ptr.vmem [resolvable:$true] %s364_s1 }
   0xd   :  { %v528_v2 = vld [vmem:[#allocation5 + $0xb8] sm:$0xff]  ;;  %319 = vmatpush.bf16.msra.mxu1 %v520_v1  ;;  %v527_v6 = vld [vmem:[#allocation5 + $0xb0] sm:$0xff]  ;;  %v518_v9 = vld [vmem:[#allocation5 + $0x68] sm:$0xff] }
   0xe   :  { %v536_v3 = vld [vmem:[#allocation5 + $0xf8] sm:$0xff]  ;;  %332 = vmatpush.bf16.msra.mxu2 %v528_v2  ;;  %v535_v7 = vld [vmem:[#allocation5 + $0xf0] sm:$0xff]  ;;  %v526_v10 = vld [vmem:[#allocation5 + $0xa8] sm:$0xff] }
   0xf   :  { %345 = vmatpush.bf16.msra.mxu3 %v536_v3  ;;  %v534_v11 = vld [vmem:[#allocation5 + $0xe8] sm:$0xff]  ;;  %v509_v12 = vld [vmem:[#allocation5 + $0x20] sm:$0xff]  ;;  %v508_v16 = vld [vmem:[#allocation5 + $0x18] sm:$0xff] }
  0x10   :  { %307 = vmatpush.bf16.msra.mxu0 %v511_v4  ;;  %v517_v13 = vld [vmem:[#allocation5 + $0x60] sm:$0xff]  ;;  %v516_v17 = vld [vmem:[#allocation5 + $0x58] sm:$0xff]  ;;  %v507_v20 = vld [vmem:[#allocation5 + $0x10] sm:$0xff] }
  0x11   :  { %320 = vmatpush.bf16.msra.mxu1 %v519_v5  ;;  %v525_v14 = vld [vmem:[#allocation5 + $0xa0] sm:$0xff]  ;;  %v524_v18 = vld [vmem:[#allocation5 + $0x98] sm:$0xff]  ;;  %v515_v21 = vld [vmem:[#allocation5 + $0x50] sm:$0xff] }
  0x12   :  { %333 = vmatpush.bf16.msra.mxu2 %v527_v6  ;;  %v533_v15 = vld [vmem:[#allocation5 + $0xe0] sm:$0xff]  ;;  %v532_v19 = vld [vmem:[#allocation5 + $0xd8] sm:$0xff]  ;;  %v523_v22 = vld [vmem:[#allocation5 + $0x90] sm:$0xff] }
  0x13   :  { %346 = vmatpush.bf16.msra.mxu3 %v535_v7  ;;  %v531_v23 = vld [vmem:[#allocation5 + $0xd0] sm:$0xff]  ;;  %v506_v24 = vld [vmem:[#allocation5 + $0x8] sm:$0xff]  ;;  %v505_v28 = vld [vmem:[#allocation5] sm:$0xff] }
  0x14   :  { %308 = vmatpush.bf16.msra.mxu0 %v510_v8  ;;  %v514_v25 = vld [vmem:[#allocation5 + $0x48] sm:$0xff]  ;;  %v513_v29 = vld [vmem:[#allocation5 + $0x40] sm:$0xff]  ;;  %v44_v34 = vld [vmem:[#allocation2 + $0x10] sm:$0xff] }
  0x15   :  { %321 = vmatpush.bf16.msra.mxu1 %v518_v9  ;;  %v522_v26 = vld [vmem:[#allocation5 + $0x88] sm:$0xff]  ;;  %v521_v30 = vld [vmem:[#allocation5 + $0x80] sm:$0xff]  ;;  %v45_v35 = vld [vmem:[#allocation2 + $0x18] sm:$0xff]  ;;  %v48_v38 = vpack.c.bf16 %v44_v34, %v44_v34 }
  0x16   :  { %334 = vmatpush.bf16.msra.mxu2 %v526_v10  ;;  %v530_v27 = vld [vmem:[#allocation5 + $0xc8] sm:$0xff]  ;;  %v42_v31 = vld [vmem:[#allocation2] sm:$0xff]  ;;  %v49_v39 = vpack.c.bf16 %v45_v35, %v45_v35 }
  0x17   :  { %347 = vmatpush.bf16.msra.mxu3 %v534_v11  ;;  %v43_v32 = vld [vmem:[#allocation2 + $0x8] sm:$0xff]  ;;  %v529_v33 = vld [vmem:[#allocation5 + $0xc0] sm:$0xff]  ;;  %v46_v36 = vpack.c.bf16 %v42_v31, %v42_v31 }
  0x18   :  { %309 = vmatpush.bf16.msra.mxu0 %v509_v12  ;;  %v47_v37 = vpack.c.bf16 %v43_v32, %v43_v32 }
  0x19   :  { %322 = vmatpush.bf16.msra.mxu1 %v517_v13 }
  0x1a   :  { %335 = vmatpush.bf16.msra.mxu2 %v525_v14 }
  0x1b   :  { %348 = vmatpush.bf16.msra.mxu3 %v533_v15 }
  0x1c   :  { %310 = vmatpush.bf16.msra.mxu0 %v508_v16 }
  0x1d   :  { %323 = vmatpush.bf16.msra.mxu1 %v516_v17 }
  0x1e   :  { %336 = vmatpush.bf16.msra.mxu2 %v524_v18 }
  0x1f   :  { %349 = vmatpush.bf16.msra.mxu3 %v532_v19 }
  0x20   :  { %311 = vmatpush.bf16.msra.mxu0 %v507_v20 }
  0x21   :  { %324 = vmatpush.bf16.msra.mxu1 %v515_v21 }
  0x22   :  { %337 = vmatpush.bf16.msra.mxu2 %v523_v22 }
  0x23   :  { %350 = vmatpush.bf16.msra.mxu3 %v531_v23 }
  0x24   :  { %312 = vmatpush.bf16.msra.mxu0 %v506_v24 }
  0x25   :  { %325 = vmatpush.bf16.msra.mxu1 %v514_v25 }
  0x26   :  { %338 = vmatpush.bf16.msra.mxu2 %v522_v26 }
  0x27   :  { %351 = vmatpush.bf16.msra.mxu3 %v530_v27 }
  0x28   :  { %313 = vmatpush.bf16.msra.mxu0 %v505_v28 }
  0x29   :  { %326 = vmatpush.bf16.msra.mxu1 %v513_v29 }
  0x2a   :  { %339 = vmatpush.bf16.msra.mxu2 %v521_v30 }
  0x2b   :  { %352 = vmatpush.bf16.msra.mxu3 %v529_v33  ;;  %314 = vmatmul.bf16.vlgmr.msra.gmra.mxu0 %v46_v36 }
  0x2c   :  { %327 = vmatmul.bf16.vlgmr.msra.gmra.mxu1 %v47_v37 }
  0x2d   :  { %340 = vmatmul.bf16.vlgmr.msra.gmra.mxu2 %v48_v38 }
  0x2e   :  { %353 = vmatmul.bf16.vlgmr.msra.gmra.mxu3 %v49_v39 }
  0xa8   :  { %v315_v40 = vpop.f32.mrf.mxu0 }
  0xa9   :  { %v328_v41 = vpop.f32.mrf.mxu1  ;;  %v316_v42 = vadd.f32 0.03125, %v315_v40 }
  0xab   :  { %v329_v43 = vadd.f32 %v328_v41, %v316_v42 }
  0xb0   :  { %v341_v44 = vpop.f32.mrf.mxu2  ;;  %v317_v47 = vpop.f32.mrf.mxu0 }
  0xb1   :  { %v354_v45 = vpop.f32.mrf.mxu3  ;;  %v342_v46 = vadd.f32 %v341_v44, %v329_v43  ;;  %v330_v48 = vpop.f32.mrf.mxu1 }
  0xb3   :  { %v355_v49 = vadd.f32 %v354_v45, %v342_v46 }
  0xb5   :  { %358 = vst [vmem:[#allocation7] sm:$0xff] %v355_v49 }
  0xb6   :  { %369 = dma.vmem_to_hbm [thread:$0]  %s365_s1, 128, %s367_s23, [#allocation4]  }
  0xb8   :  { %v343_v50 = vpop.f32.mrf.mxu2 }
  0xb9   :  { %v356_v51 = vpop.f32.mrf.mxu3 }
  0xba   :  { %618 = dma.done.wait [#allocation4], 128  }
  0xbb   :  { %619 = vsyncadd [#allocation4], 4294967168 }
  0xbc   :  { %374 = vsyncpa [#allocation3], 1 }
  0xbd   :  { %375 = vsyncpa [#allocation6], 1 }
  0xbe   :  { %376 = vsyncpa [#allocation4], 1 }

</bundles_post_ra>
